<compile_context>
chip_gen: v5e
topology: v5e:2x2
jax: 0.10.0
libtpu: 0.0.40
codegen_flags: <defaults>
</compile_context>

<pallas_src>
import math
from functools import partial

import jax
import jax.numpy as jnp
from jax import lax
from jax.experimental import pallas as pl
from jax.experimental.pallas import tpu as pltpu


# ------------------------------------------------------------------ kernels --

def _make_cached_kernel(B, T, Dp):
    """Fused QKV projection + joint-softmax attention + in-place cache append."""
    dn = (((1,), (1,)), ((), ()))  # contract last dims: q @ k^T without a transpose

    def kernel(x_ref, w_ref, b_ref, clen_ref, kc_hbm, vc_hbm,          # inputs
               o_ref, ko_hbm, vo_hbm,                                  # outputs
               kn_ref, vn_ref, kc_ref, vc_ref, rd_sem, wr_sem):        # scratch
        # 1) Prefetch the whole (padded) KV cache HBM -> VMEM; overlaps the matmul.
        rd_k = pltpu.make_async_copy(kc_hbm, kc_ref, rd_sem.at[0])
        rd_v = pltpu.make_async_copy(vc_hbm, vc_ref, rd_sem.at[1])
        rd_k.start()
        rd_v.start()

        # 2) Fused QKV projection, batch folded into M: (B*T, D) @ (D, 3*Dp).
        qkv = jnp.dot(x_ref[...], w_ref[...],
                      preferred_element_type=jnp.float32) + b_ref[...]

        clen = clen_ref[0]

        # 3) Stage the new K/V (lane-dense (T,128) tiles) and append them to the
        #    cache in place at row offset clen.  Wait for the cache read first so
        #    the aliased HBM buffer is never written before it landed in VMEM.
        for b in range(B):
            kn_ref[b] = qkv[b * T:(b + 1) * T, 1 * Dp:2 * Dp]
            vn_ref[b] = qkv[b * T:(b + 1) * T, 2 * Dp:3 * Dp]
        rd_k.wait()
        rd_v.wait()
        for b in range(B):
            pltpu.make_async_copy(kn_ref.at[b], ko_hbm.at[b, pl.ds(clen, T), :],
                                  wr_sem.at[0, b]).start()
            pltpu.make_async_copy(vn_ref.at[b], vo_hbm.at[b, pl.ds(clen, T), :],
                                  wr_sem.at[1, b]).start()

        # 4) Attention over [cache[:clen] ; new] with one joint softmax (no concat).
        for b in range(B):
            q = qkv[b * T:(b + 1) * T, 0 * Dp:1 * Dp]   # (T, Dp), already * 1/sqrt(D)
            k = qkv[b * T:(b + 1) * T, 1 * Dp:2 * Dp]
            v = qkv[b * T:(b + 1) * T, 2 * Dp:3 * Dp]
            kc = kc_ref[b]                              # (MAX_T, Dp)
            vc = vc_ref[b]

            s_new = lax.dot_general(q, k, dn, preferred_element_type=jnp.float32)
            s_old = lax.dot_general(q, kc, dn, preferred_element_type=jnp.float32)
            key_idx = lax.broadcasted_iota(jnp.int32, s_old.shape, 1)
            s_old = jnp.where(key_idx < clen, s_old, -1e30)   # mask unused cache rows

            m = jnp.maximum(jnp.max(s_old, axis=-1, keepdims=True),
                            jnp.max(s_new, axis=-1, keepdims=True))
            p_old = jnp.exp(s_old - m)
            p_new = jnp.exp(s_new - m)
            denom = (jnp.sum(p_old, axis=-1, keepdims=True) +
                     jnp.sum(p_new, axis=-1, keepdims=True))
            num = (jnp.dot(p_old, vc, preferred_element_type=jnp.float32) +
                   jnp.dot(p_new, v, preferred_element_type=jnp.float32))
            o_ref[b * T:(b + 1) * T, :] = num * pl.reciprocal(denom)

        for b in range(B):
            pltpu.make_async_copy(kn_ref.at[b], ko_hbm.at[b, pl.ds(clen, T), :],
                                  wr_sem.at[0, b]).wait()
            pltpu.make_async_copy(vn_ref.at[b], vo_hbm.at[b, pl.ds(clen, T), :],
                                  wr_sem.at[1, b]).wait()

    return kernel


def _make_nocache_kernel(B, T, Dp):
    """Fused QKV projection + softmax attention over the current tokens only."""
    dn = (((1,), (1,)), ((), ()))

    def kernel(x_ref, w_ref, b_ref, o_ref):
        qkv = jnp.dot(x_ref[...], w_ref[...],
                      preferred_element_type=jnp.float32) + b_ref[...]
        for b in range(B):
            q = qkv[b * T:(b + 1) * T, 0 * Dp:1 * Dp]
            k = qkv[b * T:(b + 1) * T, 1 * Dp:2 * Dp]
            v = qkv[b * T:(b + 1) * T, 2 * Dp:3 * Dp]
            s = lax.dot_general(q, k, dn, preferred_element_type=jnp.float32)
            m = jnp.max(s, axis=-1, keepdims=True)
            p = jnp.exp(s - m)
            denom = jnp.sum(p, axis=-1, keepdims=True)
            num = jnp.dot(p, v, preferred_element_type=jnp.float32)
            o_ref[b * T:(b + 1) * T, :] = num * pl.reciprocal(denom)

    return kernel


# ----------------------------------------------------------------- wrappers --

@partial(jax.jit, donate_argnums=(3, 4))
def _attn_step_cached(x, wqkv_t, bqkv, cache_k, cache_v, clen):
    """One decode/prefill step with KV-cache append.  Returns (out, new_K, new_V).

    cache_k/cache_v are (B, MAX_T, Dp) preallocated buffers updated in place via
    input_output_aliases; clen is the current number of valid cache rows.
    """
    B, T, D = x.shape
    Dp = wqkv_t.shape[1] // 3
    MAX_T = cache_k.shape[1]
    x2 = x.reshape(B * T, D)

    out_pad, new_k, new_v = pl.pallas_call(
        _make_cached_kernel(B, T, Dp),
        out_shape=(
            jax.ShapeDtypeStruct((B * T, Dp), jnp.float32),      # attention output
            jax.ShapeDtypeStruct((B, MAX_T, Dp), jnp.float32),   # K cache (in-place)
            jax.ShapeDtypeStruct((B, MAX_T, Dp), jnp.float32),   # V cache (in-place)
        ),
        in_specs=[
            pl.BlockSpec(memory_space=pltpu.MemorySpace.VMEM),   # x (B*T, D)
            pl.BlockSpec(memory_space=pltpu.MemorySpace.VMEM),   # fused QKV weight
            pl.BlockSpec(memory_space=pltpu.MemorySpace.VMEM),   # fused bias
            pl.BlockSpec(memory_space=pltpu.MemorySpace.SMEM),   # cache_len scalar
            pl.BlockSpec(memory_space=pl.ANY),                   # K cache (HBM)
            pl.BlockSpec(memory_space=pl.ANY),                   # V cache (HBM)
        ],
        out_specs=(
            pl.BlockSpec(memory_space=pltpu.MemorySpace.VMEM),   # out (128-lane dense)
            pl.BlockSpec(memory_space=pl.ANY),                   # K cache (same buffer)
            pl.BlockSpec(memory_space=pl.ANY),                   # V cache (same buffer)
        ),
        scratch_shapes=[
            pltpu.VMEM((B, T, Dp), jnp.float32),      # new K staging
            pltpu.VMEM((B, T, Dp), jnp.float32),      # new V staging
            pltpu.VMEM((B, MAX_T, Dp), jnp.float32),  # K cache landing buffer
            pltpu.VMEM((B, MAX_T, Dp), jnp.float32),  # V cache landing buffer
            pltpu.SemaphoreType.DMA((2,)),            # cache read sems
            pltpu.SemaphoreType.DMA((2, B)),          # cache write sems
        ],
        input_output_aliases={4: 1, 5: 2},            # caches updated in place
    )(x2, wqkv_t, bqkv, clen, cache_k, cache_v)

    out = out_pad[:, :D].reshape(B, T, D)
    return out, new_k, new_v


@jax.jit
def _attn_step_nocache(x, wqkv_t, bqkv):
    B, T, D = x.shape
    Dp = wqkv_t.shape[1] // 3
    x2 = x.reshape(B * T, D)
    out_pad = pl.pallas_call(
        _make_nocache_kernel(B, T, Dp),
        out_shape=jax.ShapeDtypeStruct((B * T, Dp), jnp.float32),
        in_specs=[pl.BlockSpec(memory_space=pltpu.MemorySpace.VMEM)] * 3,
        out_specs=pl.BlockSpec(memory_space=pltpu.MemorySpace.VMEM),
    )(x2, wqkv_t, bqkv)
    return out_pad[:, :D].reshape(B, T, D)


class Attention:
    """Mirrors the PyTorch module's stateful forward (incl. KV cache)."""

    def __init__(self, D, V, key, max_cache=128):
        self.D = D
        self.V = V
        self.max_cache = max_cache                       # preallocated cache rows
        ks = jax.random.split(key, 6)
        bound = 1.0 / math.sqrt(D)                       # torch.nn.Linear default init
        self.Wq = jax.random.uniform(ks[0], (D, D), jnp.float32, -bound, bound)
        self.Wk = jax.random.uniform(ks[1], (D, D), jnp.float32, -bound, bound)
        self.Wv = jax.random.uniform(ks[2], (D, D), jnp.float32, -bound, bound)
        self.bq = jax.random.uniform(ks[3], (1, D), jnp.float32, -bound, bound)
        self.bk = jax.random.uniform(ks[4], (1, D), jnp.float32, -bound, bound)
        self.bv = jax.random.uniform(ks[5], (1, D), jnp.float32, -bound, bound)

        # Kernel parameters: pre-transposed (in, out), lane-padded per projection to
        # Dp=128 columns (zero pad -> contributes nothing to any dot product) and
        # fused Q|K|V into one (D, 3*Dp) weight with 1/sqrt(D) folded into Q.
        self.Dp = max(128, ((D + 127) // 128) * 128)
        scale = 1.0 / math.sqrt(D)
        pad = ((0, 0), (0, self.Dp - D))
        self.Wqkv_t = jnp.concatenate(
            [jnp.pad(self.Wq.T * scale, pad),
             jnp.pad(self.Wk.T, pad),
             jnp.pad(self.Wv.T, pad)], axis=1)                 # (D, 3*Dp)
        self.bqkv = jnp.concatenate(
            [jnp.pad(self.bq * scale, pad),
             jnp.pad(self.bk, pad),
             jnp.pad(self.bv, pad)], axis=1)                   # (1, 3*Dp)

        self.cache_K = self.cache_V = None
        self.cache_len = 0

    def __call__(self, X, use_cache):
        B, T, D = X.shape
        if use_cache:
            if self.cache_K is None:
                self.cache_K = jnp.zeros((B, self.max_cache, self.Dp), jnp.float32)
                self.cache_V = jnp.zeros((B, self.max_cache, self.Dp), jnp.float32)
                self.cache_len = 0
            assert self.cache_len + T <= self.max_cache
            clen = jnp.array([self.cache_len], jnp.int32)
            out, self.cache_K, self.cache_V = _attn_step_cached(
                X, self.Wqkv_t, self.bqkv, self.cache_K, self.cache_V, clen)
            self.cache_len += T
            return out
        return _attn_step_nocache(X, self.Wqkv_t, self.bqkv)


# ------------------------------------------------------------------- main ----

if __name__ == "__main__":
    D = 32
    B, T = 2, 8
    key = jax.random.PRNGKey(0)
    k_param, k_x1, k_x2 = jax.random.split(key, 3)

    model = Attention(D, 64, k_param)

    X1 = jax.random.normal(k_x1, (B, T, D), jnp.float32)
    X2 = jax.random.normal(k_x2, (B, T, D), jnp.float32)

    # pure-JAX reference
    def lin(x, W, b):
        return x @ W.T + b

    def ref_attn(Q, K, V):
        s = jnp.einsum('bqd,bkd->bqk', Q, K) * (1.0 / math.sqrt(Q.shape[-1]))
        return jnp.einsum('bqk,bkd->bqd', jax.nn.softmax(s, axis=-1), V)

    Q1, K1, V1 = lin(X1, model.Wq, model.bq), lin(X1, model.Wk, model.bk), lin(X1, model.Wv, model.bv)
    Q2, K2, V2 = lin(X2, model.Wq, model.bq), lin(X2, model.Wk, model.bk), lin(X2, model.Wv, model.bv)

    out0 = jax.block_until_ready(model(X1, use_cache=False))   # no-cache path
    out1 = jax.block_until_ready(model(X1, use_cache=True))    # primes the cache
    out2 = jax.block_until_ready(model(X2, use_cache=True))    # attends over 2*T keys

    ref1 = ref_attn(Q1, K1, V1)
    K_tot = jnp.concatenate((K1, K2), axis=1)
    V_tot = jnp.concatenate((V1, V2), axis=1)
    ref2 = ref_attn(Q2, K_tot, V_tot)

    assert out0.shape == (B, T, D) and out1.shape == (B, T, D) and out2.shape == (B, T, D)
    assert jnp.allclose(out0, ref1, atol=1e-4, rtol=1e-4)
    assert jnp.allclose(out1, ref1, atol=1e-4, rtol=1e-4)
    assert jnp.allclose(out2, ref2, atol=1e-4, rtol=1e-4)
    # the in-place cache writeback must hold exactly the unscaled K/V projections
    assert model.cache_len == 2 * T
    assert jnp.allclose(model.cache_K[:, :2 * T, :D], K_tot, atol=1e-4, rtol=1e-4)
    assert jnp.allclose(model.cache_V[:, :2 * T, :D], V_tot, atol=1e-4, rtol=1e-4)

    print("KERNEL_OK")
</pallas_src>

<mosaic_0001>
module attributes {stable_mosaic.version = 11 : i64} {
  func.func @kernel(%arg0: memref<16x32xf32, #tpu.memory_space<vmem>>, %arg1: memref<32x384xf32, #tpu.memory_space<vmem>>, %arg2: memref<1x384xf32, #tpu.memory_space<vmem>>, %arg3: memref<16x128xf32, #tpu.memory_space<vmem>>) attributes {dimension_semantics = [], scalar_prefetch = 0 : i64, scratch_operands = 0 : i64, tpu.core_type = #tpu.core_type<tc>} {
    %c0 = arith.constant 0 : index
    %c0_0 = arith.constant 0 : index
    %0 = vector.load %arg0[%c0, %c0_0] : memref<16x32xf32, #tpu.memory_space<vmem>>, vector<16x32xf32>
    %c0_1 = arith.constant 0 : index
    %c0_2 = arith.constant 0 : index
    %1 = vector.load %arg1[%c0_1, %c0_2] : memref<32x384xf32, #tpu.memory_space<vmem>>, vector<32x384xf32>
    %cst = arith.constant dense<0.000000e+00> : vector<16x384xf32>
    %2 = tpu.matmul %0, %1, %cst {dimension_numbers = #tpu.dot_dimension_numbers<[1], [0], [0], [1], [0, 0, 1, 1], [], []>} : vector<16x32xf32>, vector<32x384xf32>, vector<16x384xf32> -> vector<16x384xf32>
    %c0_3 = arith.constant 0 : index
    %c0_4 = arith.constant 0 : index
    %3 = vector.load %arg2[%c0_3, %c0_4] : memref<1x384xf32, #tpu.memory_space<vmem>>, vector<1x384xf32>
    %4 = vector.broadcast %3 : vector<1x384xf32> to vector<16x384xf32>
    %5 = arith.addf %2, %4 : vector<16x384xf32>
    %6 = vector.extract_strided_slice %5 {offsets = [0, 0], sizes = [8, 128], strides = [1, 1]} : vector<16x384xf32> to vector<8x128xf32>
    %7 = vector.extract_strided_slice %5 {offsets = [0, 128], sizes = [8, 128], strides = [1, 1]} : vector<16x384xf32> to vector<8x128xf32>
    %8 = vector.extract_strided_slice %5 {offsets = [0, 256], sizes = [8, 128], strides = [1, 1]} : vector<16x384xf32> to vector<8x128xf32>
    %cst_5 = arith.constant dense<0.000000e+00> : vector<8x8xf32>
    %9 = tpu.matmul %6, %7, %cst_5 {dimension_numbers = #tpu.dot_dimension_numbers<[1], [1], [0], [0], [0, 0, 1, 0], [], []>} : vector<8x128xf32>, vector<8x128xf32>, vector<8x8xf32> -> vector<8x8xf32>
    %cst_6 = arith.constant dense<0xFF800000> : vector<8xf32>
    %10 = vector.multi_reduction <maximumf>, %9, %cst_6 [1] : vector<8x8xf32> to vector<8xf32>
    %11 = vector.shape_cast %10 : vector<8xf32> to vector<8x1xf32>
    %12 = vector.broadcast %11 : vector<8x1xf32> to vector<8x8xf32>
    %13 = arith.subf %9, %12 : vector<8x8xf32>
    %14 = math.exp %13 : vector<8x8xf32>
    %cst_7 = arith.constant dense<0.000000e+00> : vector<8xf32>
    %15 = vector.multi_reduction <add>, %14, %cst_7 [1] : vector<8x8xf32> to vector<8xf32>
    %16 = vector.shape_cast %15 : vector<8xf32> to vector<8x1xf32>
    %cst_8 = arith.constant dense<0.000000e+00> : vector<8x128xf32>
    %17 = tpu.matmul %14, %8, %cst_8 {dimension_numbers = #tpu.dot_dimension_numbers<[1], [0], [0], [1], [0, 0, 1, 1], [], []>} : vector<8x8xf32>, vector<8x128xf32>, vector<8x128xf32> -> vector<8x128xf32>
    %18 = tpu.reciprocal %16 : vector<8x1xf32> -> vector<8x1xf32>
    %19 = vector.broadcast %18 : vector<8x1xf32> to vector<8x128xf32>
    %20 = arith.mulf %17, %19 : vector<8x128xf32>
    %c0_9 = arith.constant 0 : index
    %c0_10 = arith.constant 0 : index
    %21 = vector.load %arg3[%c0_9, %c0_10] : memref<16x128xf32, #tpu.memory_space<vmem>>, vector<8x128xf32>
    tpu.vector_store %arg3[%c0_9, %c0_10], %20 {strides = array<i32>} : memref<16x128xf32, #tpu.memory_space<vmem>>, vector<8x128xf32>,
    %22 = vector.extract_strided_slice %5 {offsets = [8, 0], sizes = [8, 128], strides = [1, 1]} : vector<16x384xf32> to vector<8x128xf32>
    %23 = vector.extract_strided_slice %5 {offsets = [8, 128], sizes = [8, 128], strides = [1, 1]} : vector<16x384xf32> to vector<8x128xf32>
    %24 = vector.extract_strided_slice %5 {offsets = [8, 256], sizes = [8, 128], strides = [1, 1]} : vector<16x384xf32> to vector<8x128xf32>
    %cst_11 = arith.constant dense<0.000000e+00> : vector<8x8xf32>
    %25 = tpu.matmul %22, %23, %cst_11 {dimension_numbers = #tpu.dot_dimension_numbers<[1], [1], [0], [0], [0, 0, 1, 0], [], []>} : vector<8x128xf32>, vector<8x128xf32>, vector<8x8xf32> -> vector<8x8xf32>
    %cst_12 = arith.constant dense<0xFF800000> : vector<8xf32>
    %26 = vector.multi_reduction <maximumf>, %25, %cst_12 [1] : vector<8x8xf32> to vector<8xf32>
    %27 = vector.shape_cast %26 : vector<8xf32> to vector<8x1xf32>
    %28 = vector.broadcast %27 : vector<8x1xf32> to vector<8x8xf32>
    %29 = arith.subf %25, %28 : vector<8x8xf32>
    %30 = math.exp %29 : vector<8x8xf32>
    %cst_13 = arith.constant dense<0.000000e+00> : vector<8xf32>
    %31 = vector.multi_reduction <add>, %30, %cst_13 [1] : vector<8x8xf32> to vector<8xf32>
    %32 = vector.shape_cast %31 : vector<8xf32> to vector<8x1xf32>
    %cst_14 = arith.constant dense<0.000000e+00> : vector<8x128xf32>
    %33 = tpu.matmul %30, %24, %cst_14 {dimension_numbers = #tpu.dot_dimension_numbers<[1], [0], [0], [1], [0, 0, 1, 1], [], []>} : vector<8x8xf32>, vector<8x128xf32>, vector<8x128xf32> -> vector<8x128xf32>
    %34 = tpu.reciprocal %32 : vector<8x1xf32> -> vector<8x1xf32>
    %35 = vector.broadcast %34 : vector<8x1xf32> to vector<8x128xf32>
    %36 = arith.mulf %33, %35 : vector<8x128xf32>
    %c8 = arith.constant 8 : index
    %c0_15 = arith.constant 0 : index
    %37 = vector.load %arg3[%c8, %c0_15] : memref<16x128xf32, #tpu.memory_space<vmem>>, vector<8x128xf32>
    tpu.vector_store %arg3[%c8, %c0_15], %36 {strides = array<i32>} : memref<16x128xf32, #tpu.memory_space<vmem>>, vector<8x128xf32>,
    return
  }
}

</mosaic_0001>

<bundles_post_ra>
// kernel: _attn_step_nocache.1
= control target key start
LH: loop header
LB: loop body
LE: loop exit
PB: predicated region body
PF: predicated region fallthrough
CT: control target
= control target key end

     0   :  { %8 = vsyncpa [#allocation3], 0  ;;  %s453_s0 = inlined_call_operand.hbm [shape: f32[16,32], index: 0, kind: input, shape index: {}]   ;;  %s454_s1 = inlined_call_operand.hbm [shape: f32[32,384], index: 1, kind: input, shape index: {}]   ;;  %s455_s2 = inlined_call_operand.hbm [shape: f32[1,384], index: 2, kind: input, shape index: {}]   ;;  %s456_s3 = inlined_call_operand.vmem [shape: f32[16,128], index: 3, kind: output, shape index: {}]  }
   0x1   :  { %9 = vsyncpa [#allocation5], 0  ;;  %s27_s14 = sshll.u32 %s454_s1, 4  ;;  %s399_s15 = smov [#allocation4]   ;;  %s28_s14 = int_to_ptr.hbm [resolvable:$true] %s27_s14 }
   0x2   :  { %s29_s16 = sshll.u32 %s399_s15, 4  ;;  %s14_s19 = sshll.u32 %s453_s0, 4  ;;  %s30_s16 = int_to_ptr.vmem [resolvable:$true] %s29_s16  ;;  %s15_s19 = int_to_ptr.hbm [resolvable:$true] %s14_s19 }
   0x3   :  { %s400_s20 = smov 384   ;;  %s401_s21 = smov 24  }
   0x4   :  { %35 = dma.hbm_to_vmem [thread:$0]  %s28_s14, 1536, %s30_s16, [#allocation5], %s400_s20, %s400_s20, %s401_s21  }
   0x5   :  { %s402_s22 = smov [#allocation2]   ;;  %s403_s24 = smov 128  }
   0x6   :  { %s16_s23 = sshll.u32 %s402_s22, 4  ;;  %s404_s25 = smov 8   ;;  %s17_s23 = int_to_ptr.vmem [resolvable:$true] %s16_s23 }
   0x7   :  { %22 = dma.hbm_to_vmem [thread:$0]  %s15_s19, 256, %s17_s23, [#allocation3], %s403_s24, %s403_s24, %s404_s25  }
   0x8   :  { %s41_s27 = sshll.u32 %s455_s2, 4  ;;  %s405_s28 = smov [#allocation6]   ;;  %s42_s27 = int_to_ptr.hbm [resolvable:$true] %s41_s27 }
   0x9   :  { %s43_s29 = sshll.u32 %s405_s28, 4  ;;  %s44_s29 = int_to_ptr.vmem [resolvable:$true] %s43_s29 }
   0xa   :  { %46 = dma.hbm_to_vmem [thread:$0]  %s42_s27, 48, %s44_s29, [#allocation5]  }
   0xb   :  { %395 = dma.done.wait [#allocation3], 256  }
   0xc   :  { %396 = vsyncadd [#allocation3], 4294967040 }
   0xd   :  { %397 = dma.done.wait [#allocation5], 1584  }
   0xe   :  { %398 = vsyncadd [#allocation5], 4294965712  ;;  %v71_v0 = vld [vmem:[#allocation4 + $0x50] sm:$0xff]  ;;  %v68_v1 = vld [vmem:[#allocation4 + $0x38] sm:$0xff]  ;;  %vm81_vm0 = vcmask 261120   ;;  %vm177_vm1 = vcmask 64512  }
   0xf   :  { %v70_v2 = vld [vmem:[#allocation4 + $0x48] sm:$0xff]  ;;  %123 = vmatpush.msra.mxu1 %v71_v0  ;;  %v67_v3 = vld [vmem:[#allocation4 + $0x30] sm:$0xff]  ;;  %v65_v4 = vld [vmem:[#allocation4 + $0x20] sm:$0xff] }
  0x10   :  { %100 = vmatpush.msra.mxu0 %v70_v2  ;;  %v64_v5 = vld [vmem:[#allocation4 + $0x18] sm:$0xff]  ;;  %v62_v6 = vld [vmem:[#allocation4 + $0x8] sm:$0xff]  ;;  %v61_v7 = vld [vmem:[#allocation4] sm:$0xff] }
  0x11   :  { %124 = vmatpush.msra.mxu1 %v68_v1  ;;  %v59_v8 = vld [vmem:[#allocation2] sm:$0xff]  ;;  %v72_v9 = vld [vmem:[#allocation4 + $0x58] sm:$0xff]  ;;  %v69_v10 = vld [vmem:[#allocation4 + $0x40] sm:$0xff] }
  0x12   :  { %101 = vmatpush.msra.mxu0 %v67_v3  ;;  %146 = vmatpush.msra.mxu2 %v72_v9  ;;  %v66_v11 = vld [vmem:[#allocation4 + $0x28] sm:$0xff]  ;;  %v63_v12 = vld [vmem:[#allocation4 + $0x10] sm:$0xff]  ;;  %v73_v13 = vld [vmem:[#allocation6] sm:$0x7] }
  0x13   :  { %125 = vmatpush.msra.mxu1 %v65_v4  ;;  %v76_v14 = vperm.slane %v73_v13, 1  ;;  %v75_v15 = vperm.slane %v73_v13, 0  ;;  %v60_v20 = vld [vmem:[#allocation2 + $0x8] sm:$0xff]  ;;  %v77_v23 = vperm.slane %v73_v13, 2 }
  0x14   :  { %102 = vmatpush.msra.mxu0 %v64_v5  ;;  %147 = vmatpush.msra.mxu2 %v69_v10 }
  0x15   :  { %126 = vmatpush.msra.mxu1 %v62_v6 }
  0x16   :  { %103 = vmatpush.msra.mxu0 %v61_v7  ;;  %302 = vmatmul.msk.f32.vlgmr.msra.gmra.mxu1 %vm81_vm0, %v59_v8 }
  0x17   :  { %300 = vmatmul.msk.f32.vlgmr.msra.gmra.mxu0 %vm81_vm0, %v59_v8  ;;  %148 = vmatpush.msra.mxu2 %v66_v11 }
  0x19   :  { %149 = vmatpush.msra.mxu2 %v63_v12 }
  0x1a   :  { %304 = vmatmul.msk.f32.vlgmr.msra.gmra.mxu2 %vm81_vm0, %v59_v8 }
  0x1e   :  { %303 = vmatmul.msk.f32.gmra.mxu1 %vm81_vm0, %v60_v20 }
  0x1f   :  { %301 = vmatmul.msk.f32.gmra.mxu0 %vm81_vm0, %v60_v20 }
  0x22   :  { %305 = vmatmul.msk.f32.gmra.mxu2 %vm81_vm0, %v60_v20 }
  0x93   :  { %v128_v16 = vpop.f32.mrf.mxu1 }
  0x94   :  { %v105_v17 = vpop.f32.mrf.mxu0  ;;  %v129_v18 = vadd.f32 %v128_v16, %v76_v14 }
  0x95   :  { %v106_v19 = vadd.f32 %v105_v17, %v75_v15 }
  0x96   :  { %172 = vmatpush.xpose.msra.mxu3 %v129_v18 }
  0x99   :  { %173 = vmatmul.f32.vlgmr.msra.gmra.mxu3 %v106_v19 }
  0x9b   :  { %v131_v26 = vpop.f32.mrf.mxu1 }
  0x9c   :  { %v132_v27 = vadd.f32 %v131_v26, %v76_v14  ;;  %v108_v33 = vpop.f32.mrf.mxu0 }
  0x9d   :  { %v151_v24 = vpop.f32.mrf.mxu2  ;;  %v109_v34 = vadd.f32 %v108_v33, %v75_v15 }
  0x9e   :  { %v152_v25 = vadd.f32 %v151_v24, %v77_v23 }
  0xa0   :  { %205 = vmatpush.msrb.mxu3 %v152_v25 }
  0xa2   :  { %241 = vmatpush.xpose.msra.mxu3 %v132_v27 }
  0xa5   :  { %v154_v50 = vpop.f32.mrf.mxu2 }
  0xa6   :  { %v155_v51 = vadd.f32 %v154_v50, %v77_v23 }
  0xa8   :  { %273 = vmatpush.msrb.mxu0 %v155_v51 }
 0x11c   :  { %v174_v21 = vpop.f32.mrf.mxu3 }
 0x11d   :  { %v178_v22 = vsel %vm177_vm1, %v174_v21, -inf }
 0x11e   :  { %179 = vmax.xlane.f32.xlu0 %v178_v22 }
 0x191   :  { %v180_v28 = vpop.xlane.xlu0 %179 }
 0x192   :  { %v181_v29 = vsub.f32 %v174_v21, %v180_v28 }
 0x194   :  { %v182_v30 = vmul.f32 1.442695, %v181_v29 }
 0x196   :  { %315 = vpow2.f32 %v182_v30 }
 0x19c   :  { %v316_v31 = vpop.eup %315 }
 0x19d   :  { %306 = vmatmul.msk.f32.vlgmr.msrb.gmra.mxu3 %vm177_vm1, %v316_v31  ;;  %v184_v32 = vsel %vm177_vm1, %v316_v31, 0.0 }
 0x19e   :  { %185 = vadd.xlane.f32.xlu1 %v184_v32 }
 0x1a5   :  { %242 = vmatmul.f32.vlgmr.msra.gmra.mxu3 %v109_v34 }
 0x211   :  { %v186_v35 = vpop.xlane.xlu1 %185 }
 0x212   :  { %317 = vrcp.f32 %v186_v35  ;;  %v221_v39 = vand.u32 2147483648, %v186_v35  ;;  %v219_v41 = vand.u32 2147483647, %v186_v35  ;;  %vm215_vm3 = vweird.f32 %v186_v35 }
 0x214   :  { %v222_v44 = vor.u32 1.1754944e-38, %v221_v39  ;;  %vm220_vm5 = vcmp.eq.f32.partialorder %v219_v41, 8.507059e+37 }
 0x218   :  { %v318_v36 = vpop.eup %317 }
 0x219   :  { %v211_v37 = vmul.f32 %v318_v36, %v186_v35  ;;  %vm216_vm2 = vweird.f32 %v318_v36 }
 0x21a   :  { %vm217_vm4 = vmor %vm215_vm3, %vm216_vm2 }
 0x21b   :  { %v212_v38 = vsub.f32 1.0, %v211_v37 }
 0x21d   :  { %v213_v40 = vmul.f32 %v318_v36, %v212_v38 }
 0x21f   :  { %v214_v42 = vadd.f32 %v318_v36, %v213_v40 }
 0x220   :  { %v207_v43 = vpop.f32.mrf.mxu3 }
 0x221   :  { %v218_v45 = vsel %vm217_vm4, %v318_v36, %v214_v42 }
 0x222   :  { %v223_v46 = vsel %vm220_vm5, %v222_v44, %v218_v45 }
 0x223   :  { %v224_v47 = vmul.f32 %v223_v46, %v207_v43 }
 0x225   :  { %225 = vst [vmem:[%s456_s3] sm:$0xff] %v224_v47 }
 0x228   :  { %v243_v48 = vpop.f32.mrf.mxu3 }
 0x229   :  { %v246_v49 = vsel %vm177_vm1, %v243_v48, -inf }
 0x22a   :  { %247 = vmax.xlane.f32.xlu0 %v246_v49 }
 0x29d   :  { %v248_v52 = vpop.xlane.xlu0 %247 }
 0x29e   :  { %v249_v53 = vsub.f32 %v243_v48, %v248_v52 }
 0x2a0   :  { %v250_v54 = vmul.f32 1.442695, %v249_v53 }
 0x2a2   :  { %319 = vpow2.f32 %v250_v54 }
 0x2a8   :  { %v320_v55 = vpop.eup %319 }
 0x2a9   :  { %307 = vmatmul.msk.f32.vlgmr.msrb.gmra.mxu0 %vm177_vm1, %v320_v55  ;;  %v252_v56 = vsel %vm177_vm1, %v320_v55, 0.0 }
 0x2aa   :  { %253 = vadd.xlane.f32.xlu1 %v252_v56 }
 0x31d   :  { %v254_v57 = vpop.xlane.xlu1 %253 }
 0x31e   :  { %321 = vrcp.f32 %v254_v57  ;;  %v289_v61 = vand.u32 2147483648, %v254_v57  ;;  %v287_v63 = vand.u32 2147483647, %v254_v57  ;;  %vm283_vm7 = vweird.f32 %v254_v57 }
 0x320   :  { %v290_v1 = vor.u32 1.1754944e-38, %v289_v61  ;;  %vm288_vm9 = vcmp.eq.f32.partialorder %v287_v63, 8.507059e+37 }
 0x324   :  { %v322_v58 = vpop.eup %321 }
 0x325   :  { %v279_v59 = vmul.f32 %v322_v58, %v254_v57  ;;  %vm284_vm6 = vweird.f32 %v322_v58 }
 0x326   :  { %vm285_vm8 = vmor %vm283_vm7, %vm284_vm6  ;;  %v275_v3 = vpop.f32.mrf.mxu0 }
 0x327   :  { %v280_v60 = vsub.f32 1.0, %v279_v59 }
 0x329   :  { %v281_v62 = vmul.f32 %v322_v58, %v280_v60 }
 0x32b   :  { %v282_v0 = vadd.f32 %v322_v58, %v281_v62 }
 0x32d   :  { %v286_v2 = vsel %vm285_vm8, %v322_v58, %v282_v0 }
 0x32e   :  { %v291_v4 = vsel %vm288_vm9, %v290_v1, %v286_v2 }
 0x32f   :  { %v292_v5 = vmul.f32 %v291_v4, %v275_v3 }
 0x331   :  { %293 = vst [vmem:[%s456_s3 + $0x8] sm:$0xff] %v292_v5 }
 0x332   :  { %298 = vsyncpa [#allocation3], 1 }
 0x333   :  { %299 = vsyncpa [#allocation5], 1 }

</bundles_post_ra>
